<compile_context>
chip_gen: v5e
topology: v5e:2x2
jax: 0.10.0
libtpu: 0.0.40
codegen_flags: <defaults>
</compile_context>

<pallas_src>
import functools
import math

import jax
import jax.numpy as jnp
from jax.experimental import pallas as pl
from jax.experimental.pallas import tpu as pltpu

SAMPLE_RATE = 16000
N_MFCC = 40
NUM_CLASSES = 14
N_FFT = 400
HOP = 400
N_MELS = 64
H1 = 256
H2 = 128
C_PAD = 128       # fc3 matmul width (full MXU lane width)
C_OUT = 16        # stored class width (>= NUM_CLASSES, multiple of 8) -> small writeback
TILE_T_MAX = 1024 # time-tile over T; per-step VMEM ~3 MiB, safe on v5e/v6e/v7x


def _round_up(x, m):
    return ((x + m - 1) // m) * m


# ----------------------------------------------------------------------------
# Fused Pallas kernel: 3-layer MLP + softmax-over-time per batch element.
# Grid = (B, n_t); the (1, t_pad, C_OUT) output block is resident across the
# "arbitrary" time axis and normalized in place on the last time tile.
# ----------------------------------------------------------------------------
def _fused_mlp_softmax_kernel(x_ref, w1_ref, b1_ref, w2_ref, b2_ref, w3_ref, b3_ref,
                              o_ref, *, n_frames, tile_t):
    t = pl.program_id(1)

    # ---- 3-layer MLP on this time tile (bf16 MXU inputs, f32 accumulate/elementwise) ----
    x = x_ref[0]                                                     # (tile_t, 64) bf16
    h = jnp.dot(x, w1_ref[...], preferred_element_type=jnp.float32) + b1_ref[...]
    h = jnp.maximum(h, 0.0)                                          # ReLU (f32)
    # dropout(p=0.3) -> inference no-op
    h = jnp.dot(h.astype(jnp.bfloat16), w2_ref[...],
                preferred_element_type=jnp.float32) + b2_ref[...]
    h = jnp.maximum(h, 0.0)
    logits = jnp.dot(h.astype(jnp.bfloat16), w3_ref[...],
                     preferred_element_type=jnp.float32) + b3_ref[...]   # (tile_t, C_PAD)

    # Store only the first C_OUT class lanes into the per-batch resident output block.
    row = pl.multiple_of(t * tile_t, tile_t)
    o_ref[0, pl.ds(row, tile_t), :] = logits[:, :C_OUT]

    # On the last time tile: softmax over TIME (dim=1 of [B, T, C]) on the resident block.
    @pl.when(t == pl.num_programs(1) - 1)
    def _():
        z = o_ref[0]                                                 # (t_pad, C_OUT) f32
        frame = jax.lax.broadcasted_iota(jnp.int32, z.shape, 0)
        z = jnp.where(frame < n_frames, z, -1e30)                    # mask padded frames
        m = jnp.max(z, axis=0, keepdims=True)                        # max over time (sublanes)
        e = jnp.exp(z - m)
        s = jnp.sum(e, axis=0, keepdims=True)
        o_ref[0] = e / s                                             # exact normalization


def fused_mlp_softmax(features_db, kparams):
    """features_db: (B, T, N_MELS) f32 -> probabilities (B, T, NUM_CLASSES) f32."""
    w1, b1, w2, b2, w3, b3 = kparams
    B, T, _ = features_db.shape

    tile_t = min(TILE_T_MAX, _round_up(T, 8))
    t_pad = _round_up(T, tile_t)
    n_t = t_pad // tile_t

    x = jnp.pad(features_db, ((0, 0), (0, t_pad - T), (0, 0))).astype(jnp.bfloat16)

    flops = 2 * B * t_pad * (N_MELS * H1 + H1 * H2 + H2 * C_PAD)
    bytes_accessed = (x.size * 2
                      + (w1.size + w2.size + w3.size) * 2
                      + (b1.size + b2.size + b3.size) * 4
                      + B * t_pad * C_OUT * 4)

    kernel = functools.partial(_fused_mlp_softmax_kernel, n_frames=T, tile_t=tile_t)

    out = pl.pallas_call(
        kernel,
        out_shape=jax.ShapeDtypeStruct((B, t_pad, C_OUT), jnp.float32),
        grid=(B, n_t),
        in_specs=[
            pl.BlockSpec((1, tile_t, N_MELS), lambda b, t: (b, t, 0)),  # pipelined time tile
            pl.BlockSpec((N_MELS, H1), lambda b, t: (0, 0)),            # weights VMEM-resident
            pl.BlockSpec((1, H1), lambda b, t: (0, 0)),
            pl.BlockSpec((H1, H2), lambda b, t: (0, 0)),
            pl.BlockSpec((1, H2), lambda b, t: (0, 0)),
            pl.BlockSpec((H2, C_PAD), lambda b, t: (0, 0)),
            pl.BlockSpec((1, C_PAD), lambda b, t: (0, 0)),
        ],
        out_specs=pl.BlockSpec((1, t_pad, C_OUT), lambda b, t: (b, 0, 0)),
        compiler_params=pltpu.CompilerParams(
            dimension_semantics=("parallel", "arbitrary")),
        cost_estimate=pl.CostEstimate(flops=flops,
                                      transcendentals=B * t_pad * C_OUT,
                                      bytes_accessed=bytes_accessed),
    )(x, w1, b1, w2, b2, w3, b3)

    return out[:, :T, :NUM_CLASSES]


# ----------------------------------------------------------------------------
# MFCC front-end glue (plain JAX, mirrors the reference melkwargs:
# n_fft=400, hop=400, n_mels=64, hann window, center reflect-pad, power=2,
# AmplitudeToDB top_db=80). The DCT is folded into fc1 (see prepare_kernel_params).
# ----------------------------------------------------------------------------
def _hz_to_mel(f):
    return 2595.0 * jnp.log10(1.0 + f / 700.0)


def _mel_to_hz(m):
    return 700.0 * (10.0 ** (m / 2595.0) - 1.0)


def _melscale_fbanks(n_freqs, f_min, f_max, n_mels):
    freqs = jnp.linspace(0.0, float(SAMPLE_RATE // 2), n_freqs)
    m_pts = jnp.linspace(_hz_to_mel(f_min), _hz_to_mel(f_max), n_mels + 2)
    f_pts = _mel_to_hz(m_pts)
    f_diff = f_pts[1:] - f_pts[:-1]
    slopes = f_pts[None, :] - freqs[:, None]
    down = -slopes[:, :-2] / f_diff[:-1]
    up = slopes[:, 2:] / f_diff[1:]
    fb = jnp.maximum(0.0, jnp.minimum(down, up))
    return fb.astype(jnp.float32)


def _create_dct(n_mfcc, n_mels):
    n = jnp.arange(n_mels, dtype=jnp.float32)
    k = jnp.arange(n_mfcc, dtype=jnp.float32)
    dct = jnp.cos(math.pi / n_mels * (n[:, None] + 0.5) * k[None, :])   # (n_mels, n_mfcc)
    dct = dct.at[:, 0].multiply(1.0 / math.sqrt(2.0))
    dct = dct * math.sqrt(2.0 / n_mels)
    return dct.astype(jnp.float32)


def log_mel_db_features(audio):
    """audio: (B, N) f32 -> (B, T, N_MELS) dB mel-spectrogram, f32."""
    B, N = audio.shape
    pad = N_FFT // 2
    x = jnp.pad(audio, ((0, 0), (pad, pad)), mode="reflect")
    L = x.shape[1]
    num_frames = 1 + (L - N_FFT) // HOP
    # HOP == N_FFT -> frames are contiguous, non-overlapping: a reshape is exact
    # (replaces the previous advanced-index gather; perf-review item).
    frames = x[:, :num_frames * N_FFT].reshape(B, num_frames, N_FFT)
    n = jnp.arange(N_FFT, dtype=jnp.float32)
    window = 0.5 - 0.5 * jnp.cos(2.0 * math.pi * n / N_FFT)          # periodic hann
    spec = jnp.abs(jnp.fft.rfft(frames * window, axis=-1)) ** 2      # (B, T, n_fft//2+1)
    fb = _melscale_fbanks(N_FFT // 2 + 1, 0.0, SAMPLE_RATE / 2.0, N_MELS)
    mel = spec @ fb                                                  # (B, T, n_mels)
    db = 10.0 * jnp.log10(jnp.maximum(mel, 1e-10))
    db = jnp.maximum(db, jnp.max(db, axis=(1, 2), keepdims=True) - 80.0)
    return db.astype(jnp.float32)


# ----------------------------------------------------------------------------
# Parameters (deterministic synthetic init, torch-Linear-like uniform bounds)
# ----------------------------------------------------------------------------
def init_params(key):
    ks = jax.random.split(key, 6)

    def linear(kw, kb, fan_in, fan_out):
        bound = 1.0 / math.sqrt(fan_in)
        w = jax.random.uniform(kw, (fan_in, fan_out), jnp.float32, -bound, bound)
        b = jax.random.uniform(kb, (fan_out,), jnp.float32, -bound, bound)
        return w, b

    w1, b1 = linear(ks[0], ks[1], N_MFCC, H1)
    w2, b2 = linear(ks[2], ks[3], H1, H2)
    w3, b3 = linear(ks[4], ks[5], H2, NUM_CLASSES)
    return (w1, b1, w2, b2, w3, b3)


def prepare_kernel_params(params):
    """Fold the MFCC DCT into fc1, pad fc3 to a full lane width, cast weights to bf16."""
    w1, b1, w2, b2, w3, b3 = params
    dct = _create_dct(N_MFCC, N_MELS)                         # (n_mels, n_mfcc)
    w1e = (dct @ w1).astype(jnp.bfloat16)                     # (64, 256)
    w3p = jnp.zeros((H2, C_PAD), jnp.float32).at[:, :NUM_CLASSES].set(w3)
    b3p = jnp.zeros((1, C_PAD), jnp.float32).at[0, :NUM_CLASSES].set(b3)
    return (w1e,
            b1.reshape(1, H1).astype(jnp.float32),
            w2.astype(jnp.bfloat16),
            b2.reshape(1, H2).astype(jnp.float32),
            w3p.astype(jnp.bfloat16),
            b3p)


def speaker_diarization_forward(audio, kparams):
    """audio: (B, N) raw waveforms -> (B, T, NUM_CLASSES), softmax over time (dim=1)."""
    feats = log_mel_db_features(audio)            # (B, T, 64)
    return fused_mlp_softmax(feats, kparams)      # (B, T, C)


if __name__ == "__main__":
    key = jax.random.PRNGKey(0)
    k_audio, k_params = jax.random.split(key)

    B = 2
    N = 3200  # 8 hops -> T = 9 frames (center padding)
    audio = jax.random.normal(k_audio, (B, N), jnp.float32)
    kparams = prepare_kernel_params(init_params(k_params))

    fwd = jax.jit(speaker_diarization_forward)
    out = jax.block_until_ready(fwd(audio, kparams))

    assert out.shape == (B, 9, NUM_CLASSES), out.shape
    assert bool(jnp.all(jnp.isfinite(out)))
    # softmax over dim=1 (time): per-class sums over time == 1 (exact f32 normalization)
    assert jnp.allclose(jnp.sum(out, axis=1), 1.0, atol=1e-3)
    print("KERNEL_OK")
</pallas_src>

<mosaic_0001>
module attributes {stable_mosaic.version = 11 : i64} {
  func.func @_fused_mlp_softmax_kernel(%arg0: i32, %arg1: i32, %arg2: memref<1x16x64xbf16, #tpu.memory_space<vmem>>, %arg3: memref<64x256xbf16, #tpu.memory_space<vmem>>, %arg4: memref<1x256xf32, #tpu.memory_space<vmem>>, %arg5: memref<256x128xbf16, #tpu.memory_space<vmem>>, %arg6: memref<1x128xf32, #tpu.memory_space<vmem>>, %arg7: memref<128x128xbf16, #tpu.memory_space<vmem>>, %arg8: memref<1x128xf32, #tpu.memory_space<vmem>>, %arg9: memref<1x16x16xf32, #tpu.memory_space<vmem>>) attributes {dimension_semantics = [#tpu.dimension_semantics<parallel>, #tpu.dimension_semantics<arbitrary>], iteration_bounds = array<i64: 2, 1>, scalar_prefetch = 0 : i64, scratch_operands = 0 : i64, tpu.core_type = #tpu.core_type<tc>, window_params = [{transform_indices = @transform_0, window_bounds = array<i64: 1, 16, 64>}, {pipeline_mode = #tpu.pipeline_mode<synchronous>, transform_indices = @transform_1, window_bounds = array<i64: 64, 256>}, {pipeline_mode = #tpu.pipeline_mode<synchronous>, transform_indices = @transform_2, window_bounds = array<i64: 1, 256>}, {pipeline_mode = #tpu.pipeline_mode<synchronous>, transform_indices = @transform_3, window_bounds = array<i64: 256, 128>}, {pipeline_mode = #tpu.pipeline_mode<synchronous>, transform_indices = @transform_4, window_bounds = array<i64: 1, 128>}, {pipeline_mode = #tpu.pipeline_mode<synchronous>, transform_indices = @transform_5, window_bounds = array<i64: 128, 128>}, {pipeline_mode = #tpu.pipeline_mode<synchronous>, transform_indices = @transform_6, window_bounds = array<i64: 1, 128>}, {transform_indices = @transform_7, window_bounds = array<i64: 1, 16, 16>}]} {
    %c0 = arith.constant 0 : index
    %c0_0 = arith.constant 0 : index
    %c0_1 = arith.constant 0 : index
    %0 = vector.load %arg2[%c0, %c0_0, %c0_1] : memref<1x16x64xbf16, #tpu.memory_space<vmem>>, vector<1x16x64xbf16>
    %1 = vector.shape_cast %0 : vector<1x16x64xbf16> to vector<16x64xbf16>
    %c0_2 = arith.constant 0 : index
    %c0_3 = arith.constant 0 : index
    %2 = vector.load %arg3[%c0_2, %c0_3] : memref<64x256xbf16, #tpu.memory_space<vmem>>, vector<64x256xbf16>
    %cst = arith.constant dense<0.000000e+00> : vector<16x256xf32>
    %3 = tpu.matmul %1, %2, %cst {dimension_numbers = #tpu.dot_dimension_numbers<[1], [0], [0], [1], [0, 0, 1, 1], [], []>} : vector<16x64xbf16>, vector<64x256xbf16>, vector<16x256xf32> -> vector<16x256xf32>
    %c0_4 = arith.constant 0 : index
    %c0_5 = arith.constant 0 : index
    %4 = vector.load %arg4[%c0_4, %c0_5] : memref<1x256xf32, #tpu.memory_space<vmem>>, vector<1x256xf32>
    %5 = vector.broadcast %4 : vector<1x256xf32> to vector<16x256xf32>
    %6 = arith.addf %3, %5 : vector<16x256xf32>
    %cst_6 = arith.constant 0.000000e+00 : f32
    %7 = vector.broadcast %cst_6 : f32 to vector<16x256xf32>
    %8 = arith.maximumf %6, %7 : vector<16x256xf32>
    %9 = arith.truncf %8 : vector<16x256xf32> to vector<16x256xbf16>
    %c0_7 = arith.constant 0 : index
    %c0_8 = arith.constant 0 : index
    %10 = vector.load %arg5[%c0_7, %c0_8] : memref<256x128xbf16, #tpu.memory_space<vmem>>, vector<256x128xbf16>
    %cst_9 = arith.constant dense<0.000000e+00> : vector<16x128xf32>
    %11 = tpu.matmul %9, %10, %cst_9 {dimension_numbers = #tpu.dot_dimension_numbers<[1], [0], [0], [1], [0, 0, 1, 1], [], []>} : vector<16x256xbf16>, vector<256x128xbf16>, vector<16x128xf32> -> vector<16x128xf32>
    %c0_10 = arith.constant 0 : index
    %c0_11 = arith.constant 0 : index
    %12 = vector.load %arg6[%c0_10, %c0_11] : memref<1x128xf32, #tpu.memory_space<vmem>>, vector<1x128xf32>
    %13 = vector.broadcast %12 : vector<1x128xf32> to vector<16x128xf32>
    %14 = arith.addf %11, %13 : vector<16x128xf32>
    %cst_12 = arith.constant 0.000000e+00 : f32
    %15 = vector.broadcast %cst_12 : f32 to vector<16x128xf32>
    %16 = arith.maximumf %14, %15 : vector<16x128xf32>
    %17 = arith.truncf %16 : vector<16x128xf32> to vector<16x128xbf16>
    %c0_13 = arith.constant 0 : index
    %c0_14 = arith.constant 0 : index
    %18 = vector.load %arg7[%c0_13, %c0_14] : memref<128x128xbf16, #tpu.memory_space<vmem>>, vector<128x128xbf16>
    %cst_15 = arith.constant dense<0.000000e+00> : vector<16x128xf32>
    %19 = tpu.matmul %17, %18, %cst_15 {dimension_numbers = #tpu.dot_dimension_numbers<[1], [0], [0], [1], [0, 0, 1, 1], [], []>} : vector<16x128xbf16>, vector<128x128xbf16>, vector<16x128xf32> -> vector<16x128xf32>
    %c0_16 = arith.constant 0 : index
    %c0_17 = arith.constant 0 : index
    %20 = vector.load %arg8[%c0_16, %c0_17] : memref<1x128xf32, #tpu.memory_space<vmem>>, vector<1x128xf32>
    %21 = vector.broadcast %20 : vector<1x128xf32> to vector<16x128xf32>
    %22 = arith.addf %19, %21 : vector<16x128xf32>
    %c16_i32 = arith.constant 16 : i32
    %23 = arith.muli %arg1, %c16_i32 : i32
    %24 = tpu.assume_multiple %23, 16 : i32
    %25 = vector.extract_strided_slice %22 {offsets = [0, 0], sizes = [16, 16], strides = [1, 1]} : vector<16x128xf32> to vector<16x16xf32>
    %c0_18 = arith.constant 0 : index
    %26 = arith.index_cast %24 : i32 to index
    %c0_19 = arith.constant 0 : index
    %27 = vector.load %arg9[%c0_18, %26, %c0_19] : memref<1x16x16xf32, #tpu.memory_space<vmem>>, vector<1x16x16xf32>
    %28 = vector.shape_cast %27 : vector<1x16x16xf32> to vector<16x16xf32>
    %29 = vector.shape_cast %25 : vector<16x16xf32> to vector<1x16x16xf32>
    tpu.vector_store %arg9[%c0_18, %26, %c0_19], %29 {strides = array<i32>} : memref<1x16x16xf32, #tpu.memory_space<vmem>>, vector<1x16x16xf32>,
    %c0_i32 = arith.constant 0 : i32
    %30 = arith.cmpi eq, %arg1, %c0_i32 : i32
    %31 = arith.extui %30 : i1 to i32
    %c0_i32_20 = arith.constant 0 : i32
    %32 = arith.cmpi ne, %31, %c0_i32_20 : i32
    scf.if %32 {
      %c0_21 = arith.constant 0 : index
      %c0_22 = arith.constant 0 : index
      %c0_23 = arith.constant 0 : index
      %33 = vector.load %arg9[%c0_21, %c0_22, %c0_23] : memref<1x16x16xf32, #tpu.memory_space<vmem>>, vector<1x16x16xf32>
      %34 = vector.shape_cast %33 : vector<1x16x16xf32> to vector<16x16xf32>
      %35 = tpu.iota {dimensions = array<i32: 0>} : vector<16x16xi32>
      %c9_i32 = arith.constant 9 : i32
      %36 = vector.broadcast %c9_i32 : i32 to vector<16x16xi32>
      %37 = arith.cmpi slt, %35, %36 : vector<16x16xi32>
      %cst_24 = arith.constant -1.000000e+30 : f32
      %38 = vector.broadcast %cst_24 : f32 to vector<16x16xf32>
      %39 = arith.select %37, %34, %38 : vector<16x16xi1>, vector<16x16xf32>
      %cst_25 = arith.constant dense<0xFF800000> : vector<16xf32>
      %40 = vector.multi_reduction <maximumf>, %39, %cst_25 [0] : vector<16x16xf32> to vector<16xf32>
      %41 = vector.shape_cast %40 : vector<16xf32> to vector<1x16xf32>
      %42 = vector.broadcast %41 : vector<1x16xf32> to vector<16x16xf32>
      %43 = arith.subf %39, %42 : vector<16x16xf32>
      %44 = math.exp %43 : vector<16x16xf32>
      %cst_26 = arith.constant dense<0.000000e+00> : vector<16xf32>
      %45 = vector.multi_reduction <add>, %44, %cst_26 [0] : vector<16x16xf32> to vector<16xf32>
      %46 = vector.shape_cast %45 : vector<16xf32> to vector<1x16xf32>
      %47 = vector.broadcast %46 : vector<1x16xf32> to vector<16x16xf32>
      %48 = arith.divf %44, %47 : vector<16x16xf32>
      %c0_27 = arith.constant 0 : index
      %c0_28 = arith.constant 0 : index
      %c0_29 = arith.constant 0 : index
      %49 = vector.load %arg9[%c0_27, %c0_28, %c0_29] : memref<1x16x16xf32, #tpu.memory_space<vmem>>, vector<1x16x16xf32>
      %50 = vector.shape_cast %49 : vector<1x16x16xf32> to vector<16x16xf32>
      %51 = vector.shape_cast %48 : vector<16x16xf32> to vector<1x16x16xf32>
      tpu.vector_store %arg9[%c0_27, %c0_28, %c0_29], %51 {strides = array<i32>} : memref<1x16x16xf32, #tpu.memory_space<vmem>>, vector<1x16x16xf32>,
    } else {
    }
    return
  }
  func.func @transform_0(%arg0: i32, %arg1: i32) -> (i32, i32, i32) {
    %c0_i32 = arith.constant 0 : i32
    %c0_i32_0 = arith.constant 0 : i32
    return %arg0, %arg1, %c0_i32 : i32, i32, i32
  }
  func.func @transform_1(%arg0: i32, %arg1: i32) -> (i32, i32) {
    %c0_i32 = arith.constant 0 : i32
    %c0_i32_0 = arith.constant 0 : i32
    %c0_i32_1 = arith.constant 0 : i32
    return %c0_i32, %c0_i32_0 : i32, i32
  }
  func.func @transform_2(%arg0: i32, %arg1: i32) -> (i32, i32) {
    %c0_i32 = arith.constant 0 : i32
    %c0_i32_0 = arith.constant 0 : i32
    %c0_i32_1 = arith.constant 0 : i32
    return %c0_i32, %c0_i32_0 : i32, i32
  }
  func.func @transform_3(%arg0: i32, %arg1: i32) -> (i32, i32) {
    %c0_i32 = arith.constant 0 : i32
    %c0_i32_0 = arith.constant 0 : i32
    %c0_i32_1 = arith.constant 0 : i32
    return %c0_i32, %c0_i32_0 : i32, i32
  }
  func.func @transform_4(%arg0: i32, %arg1: i32) -> (i32, i32) {
    %c0_i32 = arith.constant 0 : i32
    %c0_i32_0 = arith.constant 0 : i32
    %c0_i32_1 = arith.constant 0 : i32
    return %c0_i32, %c0_i32_0 : i32, i32
  }
  func.func @transform_5(%arg0: i32, %arg1: i32) -> (i32, i32) {
    %c0_i32 = arith.constant 0 : i32
    %c0_i32_0 = arith.constant 0 : i32
    %c0_i32_1 = arith.constant 0 : i32
    return %c0_i32, %c0_i32_0 : i32, i32
  }
  func.func @transform_6(%arg0: i32, %arg1: i32) -> (i32, i32) {
    %c0_i32 = arith.constant 0 : i32
    %c0_i32_0 = arith.constant 0 : i32
    %c0_i32_1 = arith.constant 0 : i32
    return %c0_i32, %c0_i32_0 : i32, i32
  }
  func.func @transform_7(%arg0: i32, %arg1: i32) -> (i32, i32, i32) {
    %c0_i32 = arith.constant 0 : i32
    %c0_i32_0 = arith.constant 0 : i32
    %c0_i32_1 = arith.constant 0 : i32
    return %arg0, %c0_i32, %c0_i32_0 : i32, i32, i32
  }
}

</mosaic_0001>

<bundles_post_ra>
// kernel: reverse.1
= control target key start
LH: loop header
LB: loop body
LE: loop exit
PB: predicated region body
PF: predicated region fallthrough
CT: control target
= control target key end

     0   :  { %v2_v0 = vlaneseq  ;;  %s315_s0 = inlined_call_operand.vmem [shape: f32[2,256], index: 0, kind: input, shape index: {}]   ;;  %s316_s1 = inlined_call_operand.vmem [shape: f32[2,256], index: 1, kind: output, shape index: {}]  }
   0x2   :  { %v3_v1 = vsub.s32 127, %v2_v0 }
   0x4   :  { %4 = vset.pattern.permute.xlu0 %v3_v1 }
   0x5   :  { %s275_s6 = smov 0   ;;  %s277_s7 = smov 0  }
   0x6   :  { %s279_s8 = smov 0  }
   0x7 LB: > { %s205_s9 = sadd.s32 4294967295, %s263_s8   ;;  %s19_s10 = sadd.s32 1, %s259_s7  ;;  %s263_s8 = sphi %s279_s8, %s10_s8   ;;  %s259_s7 = sphi %s277_s7, %s318_s7   ;;  %s255_s6 = sphi %s275_s6, %s317_s6  }
   0x8   : > { %p20_p0 = scmp.ge.s32.totalorder %s19_s10, 2  ;;  %p207_p1 = scmp.ge.s32.totalorder %s263_s8, 2 }
   0x9   : > { %s38_s11 = sand.u32 (!%p207_p1), 1, %s263_s8   ;;  %s41_s12 = ssub.s32 (!%p207_p1), 1, %s259_s7 }
   0xa   : > { %s320_s10 = smov (%p20_p0, %s19_s10), 0  ;;  %36 = sbr.rel (%p207_p1) target bundleno = 17 (0x11), region = 16 }
   0xb   : > { %s208_s13 = sshll.u32 (!%p207_p1), %s38_s11, 1  ;;  %s209_s14 = sshll.u32 (!%p207_p1), %s41_s12, 1 }
   0xc   : > { %s45_s17 = scalar_lea.vmem (!%p207_p1), %s315_s0, %s209_s14  ;;  %s40_s18 = scalar_lea.vmem (!%p207_p1), [#allocation1], %s208_s13 }
   0xf   : > { %v62_v2 = vld [vmem:[%s45_s17] sm:$0x3] }
  0x10   : > { %63 = vst [vmem:[%s40_s18] sm:$0x3] %v62_v2 }
  0x11 PF: > { %p210_p2 = scmp.ge.s32.totalorder %s263_s8, 1  ;;  %p80_p3 = scmp.lt.s32.totalorder %s263_s8, 3 }
  0x13   : > { %p81_p4 = pnand %p210_p2, %p80_p3 }
  0x14   : > { %s91_s19 = sand.u32 (!%p81_p4), 1, %s205_s9   ;;  %s214_s23 = sshll.u32 (!%p81_p4), %s255_s6, 1 }
  0x15   : > { %84 = sbr.rel (%p81_p4) target bundleno = 167 (0xa7), region = 50  ;;  %s211_s20 = sshll.u32 (!%p81_p4), %s91_s19, 1 }
  0x16   : > { %s93_s21 = scalar_lea.vmem (!%p81_p4), [#allocation1], %s211_s20  ;;  %s97_s22 = scalar_lea.vmem (!%p81_p4), [#allocation3], %s211_s20 }
  0x17   : > { %s120_s26 = scalar_lea.vmem (!%p81_p4), %s316_s1, %s214_s23 }
  0x1a   : > { %v100_v3 = vld [vmem:[%s93_s21] sm:$0x3] }
  0x1b   : > { %101 = vst [vmem:[#allocation0] sm:$0x3] %v100_v3 }
  0x22   : > { %v103_v4 = vld [vmem:[#allocation0] sm:$0xff] }
  0x23   : > { %104 = vperm.xlu0 %4, %v103_v4  }
  0x95   : > { %v105_v5 = vpop.permute.xlu0 %104 }
  0x96   : > { %106 = vst [vmem:[#allocation2] sm:$0xff] %v105_v5 }
  0x9d   : > { %v109_v6 = vld [vmem:[#allocation2] sm:$0x3] }
  0x9e   : > { %112 = vst [vmem:[%s97_s22] sm:$0x3] %v109_v6 }
  0xa5   : > { %v137_v7 = vld [vmem:[%s97_s22] sm:$0x3] }
  0xa6   : > { %138 = vst [vmem:[%s120_s26] sm:$0x3] %v137_v7 }
  0xa7 PF: > { %s10_s8 = sadd.s32 1, %s263_s8   ;;  %s317_s6 = smov %s259_s7 }
  0xa8   : > { %p7_p5 = scmp.ge.s32.totalorder %s10_s8, 4   ;;  %s318_s7 = smov %s320_s10 }
  0xaa   :  { %9 = sbr.rel (!%p7_p5) target bundleno = 7 (0x7), region = 110 }

// kernel: speaker_diarization_forward.1
= control target key start
LH: loop header
LB: loop body
LE: loop exit
PB: predicated region body
PF: predicated region fallthrough
CT: control target
= control target key end

     0   :  { %s1059_s24 = smov 0   ;;  %s1061_s25 = smov 0   ;;  %s1241_s0 = inlined_call_operand.vmem [shape: bf16[2,16,64], index: 0, kind: input, shape index: {}]   ;;  %s1242_s1 = inlined_call_operand.vmem [shape: bf16[64,256], index: 1, kind: input, shape index: {}]   ;;  %s1243_s2 = inlined_call_operand.vmem [shape: f32[1,256], index: 2, kind: input, shape index: {}]   ;;  %s1244_s3 = inlined_call_operand.vmem [shape: bf16[256,128], index: 3, kind: input, shape index: {}]   ;;  %s1245_s4 = inlined_call_operand.vmem [shape: f32[1,128], index: 4, kind: input, shape index: {}]   ;;  %s1246_s5 = inlined_call_operand.vmem [shape: bf16[128,128], index: 5, kind: input, shape index: {}]   ;;  %s1247_s6 = inlined_call_operand.vmem [shape: f32[1,128], index: 6, kind: input, shape index: {}]   ;;  %s1248_s7 = inlined_call_operand.vmem [shape: f32[2,16,16], index: 7, kind: output, shape index: {}]  }
   0x1   :  { %s1063_s26 = smov 0  }
   0x2 LB: > { %s29_s27 = sadd.s32 1, %s1013_s25  ;;  %p787_p0 = scmp.ge.s32.totalorder %s1017_s26, 1  ;;  %s1017_s26 = sphi %s1063_s26, %s17_s26   ;;  %s1013_s25 = sphi %s1061_s25, %s1250_s25   ;;  %s1009_s24 = sphi %s1059_s24, %s1249_s24  }
   0x3   : > { %p31_p1 = scmp.ge.s32.totalorder %s29_s27, 2  ;;  %p256_p2 = scmp.lt.s32.totalorder %s1017_s26, 3 }
   0x5   : > { %s1252_s27 = smov (%p31_p1, %s29_s27), 0  ;;  %p257_p3 = pnand %p787_p0, %p256_p2 }
   0x6   : > { %p293_p4 = scmp.lt.s32.totalorder (!%p257_p3), %s1009_s24, 1 }
   0x7   : > { %260 = sbr.rel (%p257_p3) target bundleno = 540 (0x21c), region = 48 }
   0xc   : > { %v822_v0 = vld [vmem:[%s1242_s1 + $0x30] sm:$0xf]  ;;  %v938_v1 = vld [vmem:[%s1242_s1 + $0x34] sm:$0xf0]  ;;  %v814_v2 = vld [vmem:[%s1242_s1 + $0x20] sm:$0xf] }
   0xd   : > { %v823_v3 = vor.u32 %v938_v1, %v822_v0  ;;  %v936_v4 = vld [vmem:[%s1242_s1 + $0x24] sm:$0xf0]  ;;  %v806_v6 = vld [vmem:[%s1242_s1 + $0x10] sm:$0xf]  ;;  %v934_v7 = vld [vmem:[%s1242_s1 + $0x14] sm:$0xf0] }
   0xe   : > { %v815_v5 = vor.u32 %v936_v4, %v814_v2  ;;  %s1254_s24 = smov (!%p293_p4, %s1009_s24), 1  ;;  %v946_v8 = vld [vmem:[%s1244_s3 + $0x38] sm:$0xff]  ;;  %v945_v9 = vld [vmem:[%s1244_s3 + $0x30] sm:$0xff]  ;;  %v807_v10 = vor.u32 %v934_v7, %v806_v6  ;;  %v798_v11 = vld [vmem:[%s1242_s1] sm:$0xf]  ;;  %vm369_vm0 = vcmask 523264  }
   0xf   : > { %377 = vmatpush.bf16.msra.mxu1 %v823_v3  ;;  %539 = vmatpush.bf16.msra.mxu2 %v946_v8  ;;  %v932_v12 = vld [vmem:[%s1242_s1 + $0x4] sm:$0xf0]  ;;  %s928_s29 = sshll.u32 %s1254_s24, 3  ;;  %v937_v13 = vld [vmem:[%s1242_s1 + $0x34] sm:$0xf]  ;;  %v943_v21 = vld [vmem:[%s1244_s3 + $0x20] sm:$0xff] }
  0x10   : > { %v824_v14 = vld [vmem:[%s1242_s1 + $0x38] sm:$0xf0]  ;;  %v944_v15 = vld [vmem:[%s1244_s3 + $0x28] sm:$0xff]  ;;  %v799_v16 = vor.u32 %v932_v12, %v798_v11  ;;  %s300_s15 = scalar_lea.vmem %s1241_s0, %s928_s29  ;;  %v935_v18 = vld [vmem:[%s1242_s1 + $0x24] sm:$0xf]  ;;  %s929_s17 = sshll.u32 %s1254_s24, 4 }
  0x11   : > { %v827_v17 = vor.u32 %v937_v13, %v824_v14  ;;  %v816_v19 = vld [vmem:[%s1242_s1 + $0x28] sm:$0xf0]  ;;  %v930_v20 = vld [vmem:[%s300_s15] sm:$0xff]  ;;  %v933_v23 = vld [vmem:[%s1242_s1 + $0x14] sm:$0xf]  ;;  %s1216_s22 = scalar_lea.vmem %s1248_s7, %s929_s17  ;;  %vm654_vm1 = vcmask 130048  }
  0x12   : > { %v819_v22 = vor.u32 %v935_v18, %v816_v19  ;;  %v808_v24 = vld [vmem:[%s1242_s1 + $0x18] sm:$0xf0]  ;;  %v931_v26 = vld [vmem:[%s1242_s1 + $0x4] sm:$0xf]  ;;  %v800_v27 = vld [vmem:[%s1242_s1 + $0x8] sm:$0xf0] }
  0x13   : > { %378 = vmatpush.bf16.msra.mxu1 %v815_v5  ;;  %540 = vmatpush.bf16.msra.mxu2 %v945_v9  ;;  %v811_v25 = vor.u32 %v933_v23, %v808_v24  ;;  %v803_v28 = vor.u32 %v931_v26, %v800_v27  ;;  %v942_v29 = vld [vmem:[%s1244_s3 + $0x18] sm:$0xff]  ;;  %v941_v31 = vld [vmem:[%s1244_s3 + $0x10] sm:$0xff]  ;;  %v940_v33 = vld [vmem:[%s1244_s3 + $0x8] sm:$0xff] }
  0x14   : > { %v954_v30 = vld [vmem:[%s1244_s3 + $0x78] sm:$0xff]  ;;  %v953_v32 = vld [vmem:[%s1244_s3 + $0x70] sm:$0xff]  ;;  %v952_v34 = vld [vmem:[%s1244_s3 + $0x68] sm:$0xff] }
  0x15   : > { %553 = vmatpush.bf16.msra.mxu3 %v954_v30  ;;  %v939_v35 = vld [vmem:[%s1244_s3] sm:$0xff]  ;;  %v950_v37 = vld [vmem:[%s1244_s3 + $0x58] sm:$0xff]  ;;  %v949_v38 = vld [vmem:[%s1244_s3 + $0x50] sm:$0xff] }
  0x16   : > { %v951_v36 = vld [vmem:[%s1244_s3 + $0x60] sm:$0xff]  ;;  %v948_v39 = vld [vmem:[%s1244_s3 + $0x48] sm:$0xff]  ;;  %v962_v58 = vld [vmem:[%s1246_s5 + $0x38] sm:$0xff] }
  0x17   : > { %379 = vmatpush.bf16.msra.mxu1 %v807_v10  ;;  %541 = vmatpush.bf16.msra.mxu2 %v944_v15  ;;  %v947_v40 = vld [vmem:[%s1244_s3 + $0x40] sm:$0xff]  ;;  %v961_v59 = vld [vmem:[%s1246_s5 + $0x30] sm:$0xff]  ;;  %v960_v60 = vld [vmem:[%s1246_s5 + $0x28] sm:$0xff] }
  0x18   : > { %v318_v41 = vld [vmem:[%s1243_s2] sm:$0x3]  ;;  %638 = vmatpush.bf16.msra.mxu0 %v962_v58  ;;  %v958_v62 = vld [vmem:[%s1246_s5 + $0x18] sm:$0xff]  ;;  %v957_v63 = vld [vmem:[%s1246_s5 + $0x10] sm:$0xff] }
  0x19   : > { %554 = vmatpush.bf16.msra.mxu3 %v953_v32  ;;  %v320_v43 = vperm.slane %v318_v41, 0  ;;  %v321_v51 = vperm.slane %v318_v41, 1  ;;  %v959_v61 = vld [vmem:[%s1246_s5 + $0x20] sm:$0xff]  ;;  %v956_v0 = vld [vmem:[%s1246_s5 + $0x8] sm:$0xff] }
  0x1a   : > { %v955_v1 = vld [vmem:[%s1246_s5] sm:$0xff] }
  0x1b   : > { %380 = vmatpush.bf16.msra.mxu1 %v799_v16  ;;  %542 = vmatpush.bf16.msra.mxu2 %v943_v21  ;;  %v987_v4 = vld [vmem:[%s1245_s4] ss:$0 sm:$0xff] }
  0x1c   : > { %639 = vmatpush.bf16.msra.mxu0 %v961_v59  ;;  %v988_v14 = vld [vmem:[%s1247_s6] ss:$0 sm:$0xff] }
  0x1d   : > { %555 = vmatpush.bf16.msra.mxu3 %v952_v34 }
  0x1e   : > { %828 = vmatmul.msk.bf16.vlgmr.msra.gmra.mxu1 %vm369_vm0, %v930_v20 }
  0x1f   : > { %391 = vmatpush.bf16.msrb.mxu1 %v827_v17  ;;  %543 = vmatpush.bf16.msra.mxu2 %v942_v29  ;;  %v663_v17 = vlaneseq }
  0x20   : > { %640 = vmatpush.bf16.msra.mxu0 %v960_v60 }
  0x21   : > { %556 = vmatpush.bf16.msra.mxu3 %v951_v36  ;;  %v664_v19 = vshrl.u32 %v663_v17, 7 }
  0x23   : > { %392 = vmatpush.bf16.msrb.mxu1 %v819_v22  ;;  %544 = vmatpush.bf16.msra.mxu2 %v941_v31  ;;  %v665_v21 = vadd.s32 8, %v664_v19 }
  0x24   : > { %641 = vmatpush.bf16.msra.mxu0 %v959_v61 }
  0x25   : > { %557 = vmatpush.bf16.msra.mxu3 %v950_v37  ;;  %vm667_vm2 = vcmp.lt.s32.totalorder %v665_v21, 9 }
  0x27   : > { %393 = vmatpush.bf16.msrb.mxu1 %v811_v25  ;;  %545 = vmatpush.bf16.msra.mxu2 %v940_v33 }
  0x28   : > { %642 = vmatpush.bf16.msra.mxu0 %v958_v62 }
  0x29   : > { %558 = vmatpush.bf16.msra.mxu3 %v949_v38 }
  0x2b   : > { %394 = vmatpush.bf16.msrb.mxu1 %v803_v28  ;;  %546 = vmatpush.bf16.msra.mxu2 %v939_v35 }
  0x2c   : > { %643 = vmatpush.bf16.msra.mxu0 %v957_v63 }
  0x2d   : > { %559 = vmatpush.bf16.msra.mxu3 %v948_v39 }
  0x2e   : > { %829 = vmatmul.msk.bf16.vlgmr.msrb.gmra.mxu1 %vm369_vm0, %v930_v20 }
  0x30   : > { %644 = vmatpush.bf16.msra.mxu0 %v956_v0 }
  0x31   : > { %560 = vmatpush.bf16.msra.mxu3 %v947_v40 }
  0x34   : > { %645 = vmatpush.bf16.msra.mxu0 %v955_v1 }
  0x9b   : > { %v382_v42 = vpop.f32.mrf.mxu1 }
  0x9c   : > { %v383_v44 = vadd.f32 %v382_v42, %v320_v43 }
  0x9e   : > { %v401_v47 = vmax.f32 %v383_v44, 0.0 }
  0xa3   : > { %v384_v45 = vpop.f32.mrf.mxu1 }
  0xa4   : > { %v385_v46 = vadd.f32 %v384_v45, %v320_v43 }
  0xa6   : > { %v403_v48 = vmax.f32 %v385_v46, 0.0 }
  0xa8   : > { %v405_v49 = vpack.c.bf16 %v403_v48, %v401_v47 }
  0xaa   : > { %547 = vmatmul.bf16.vlgmr.msra.gmra.mxu2 %v405_v49 }
  0xab   : > { %v396_v50 = vpop.f32.mrf.mxu1 }
  0xac   : > { %v397_v52 = vadd.f32 %v396_v50, %v321_v51 }
  0xae   : > { %v402_v55 = vmax.f32 %v397_v52, 0.0 }
  0xb3   : > { %v398_v53 = vpop.f32.mrf.mxu1 }
  0xb4   : > { %v399_v54 = vadd.f32 %v398_v53, %v321_v51 }
  0xb6   : > { %v404_v56 = vmax.f32 %v399_v54, 0.0 }
  0xb8   : > { %v406_v57 = vpack.c.bf16 %v404_v56, %v402_v55 }
  0xba   : > { %561 = vmatmul.bf16.vlgmr.msra.gmra.mxu3 %v406_v57 }
 0x12d   : > { %v548_v2 = vpop.f32.mrf.mxu2 }
 0x12e   : > { %v549_v6 = vadd.f32 %v987_v4, %v548_v2 }
 0x135   : > { %v550_v5 = vpop.f32.mrf.mxu2 }
 0x136   : > { %v551_v7 = vadd.f32 %v987_v4, %v550_v5 }
 0x13d   : > { %v562_v3 = vpop.f32.mrf.mxu3 }
 0x13e   : > { %v563_v8 = vadd.f32 %v562_v3, %v549_v6 }
 0x140   : > { %v567_v11 = vmax.f32 %v563_v8, 0.0 }
 0x145   : > { %v564_v9 = vpop.f32.mrf.mxu3 }
 0x146   : > { %v565_v10 = vadd.f32 %v564_v9, %v551_v7 }
 0x148   : > { %v568_v12 = vmax.f32 %v565_v10, 0.0 }
 0x14a   : > { %v569_v13 = vpack.c.bf16 %v568_v12, %v567_v11 }
 0x14c   : > { %646 = vmatmul.bf16.vlgmr.msra.gmra.mxu0 %v569_v13 }
 0x1c9   : > { %v647_v15 = vpop.f32.mrf.mxu0 }
 0x1ca   : > { %v648_v16 = vadd.f32 %v988_v14, %v647_v15 }
 0x1cc   : > { %655 = vst.msk [vmem:[%s1216_s22] sm:$0xff] %vm654_vm1, %v648_v16 }
 0x1d1   : > { %v649_v18 = vpop.f32.mrf.mxu0 }
 0x1d2   : > { %v650_v20 = vadd.f32 %v988_v14, %v649_v18 }
 0x1d3   : > { %v661_v22 = vld [vmem:[%s1216_s22] sm:$0xff] }
 0x1d4   : > { %656 = vst.msk [vmem:[%s1216_s22 + $0x8] sm:$0xff] %vm654_vm1, %v650_v20  ;;  %v670_v25 = vsel %vm654_vm1, %v661_v22, -inf }
 0x1db   : > { %v662_v23 = vld [vmem:[%s1216_s22 + $0x8] sm:$0xff] }
 0x1dc   : > { %v669_v24 = vsel %vm667_vm2, %v662_v23, -1e+30 }
 0x1dd   : > { %v671_v26 = vsel %vm654_vm1, %v669_v24, -inf }
 0x1de   : > { %v672_v27 = vmax.f32 %v670_v25, %v671_v26 }
 0x1e0   : > { %v673_v28 = vrot.slane %v672_v27, 4 }
 0x1e2   : > { %v674_v29 = vmax.f32 %v672_v27, %v673_v28 }
 0x1e4   : > { %v675_v30 = vrot.slane %v674_v29, 2 }
 0x1e6   : > { %v676_v31 = vmax.f32 %v674_v29, %v675_v30 }
 0x1e8   : > { %v677_v32 = vrot.slane %v676_v31, 1 }
 0x1ea   : > { %v678_v33 = vmax.f32 %v676_v31, %v677_v32 }
 0x1ec   : > { %v679_v34 = vsub.f32 %v661_v22, %v678_v33  ;;  %v680_v35 = vsub.f32 %v669_v24, %v678_v33 }
 0x1ee   : > { %v681_v36 = vmul.f32 1.442695, %v679_v34  ;;  %v683_v37 = vmul.f32 1.442695, %v680_v35 }
 0x1f0   : > { %989 = vpow2.f32 %v681_v36 }
 0x1f1   : > { %991 = vpow2.f32 %v683_v37 }
 0x1f6   : > { %v990_v38 = vpop.eup %989 }
 0x1f7   : > { %v992_v39 = vpop.eup %991  ;;  %v685_v40 = vsel %vm654_vm1, %v990_v38, 0.0 }
 0x1f8   : > { %v686_v41 = vsel %vm654_vm1, %v992_v39, 0.0 }
 0x1f9   : > { %v687_v42 = vadd.f32 %v686_v41, %v685_v40 }
 0x1fb   : > { %v688_v43 = vrot.slane %v687_v42, 4 }
 0x1fd   : > { %v689_v44 = vadd.f32 %v688_v43, %v687_v42 }
 0x1ff   : > { %v690_v45 = vrot.slane %v689_v44, 2 }
 0x201   : > { %v691_v46 = vadd.f32 %v690_v45, %v689_v44 }
 0x203   : > { %v692_v47 = vrot.slane %v691_v46, 1 }
 0x205   : > { %v693_v48 = vadd.f32 %v692_v47, %v691_v46 }
 0x207   : > { %993 = vrcp.f32 %v693_v48  ;;  %v705_v52 = vand.u32 2147483648, %v693_v48  ;;  %v703_v54 = vand.u32 2147483647, %v693_v48  ;;  %vm699_vm4 = vweird.f32 %v693_v48 }
 0x209   : > { %v706_v56 = vor.u32 1.1754944e-38, %v705_v52  ;;  %vm704_vm6 = vcmp.eq.f32.partialorder %v703_v54, 8.507059e+37 }
 0x20d   : > { %v994_v49 = vpop.eup %993 }
 0x20e   : > { %v695_v50 = vmul.f32 %v994_v49, %v693_v48  ;;  %vm700_vm3 = vweird.f32 %v994_v49 }
 0x20f   : > { %vm701_vm5 = vmor %vm699_vm4, %vm700_vm3 }
 0x210   : > { %v696_v51 = vsub.f32 1.0, %v695_v50 }
 0x212   : > { %v697_v53 = vmul.f32 %v994_v49, %v696_v51 }
 0x214   : > { %v698_v55 = vadd.f32 %v994_v49, %v697_v53 }
 0x216   : > { %v702_v57 = vsel %vm701_vm5, %v994_v49, %v698_v55 }
 0x217   : > { %v707_v58 = vsel %vm704_vm6, %v706_v56, %v702_v57 }
 0x218   : > { %v708_v59 = vmul.f32 %v990_v38, %v707_v58  ;;  %v709_v60 = vmul.f32 %v992_v39, %v707_v58 }
 0x21a   : > { %710 = vst.msk [vmem:[%s1216_s22] sm:$0xff] %vm654_vm1, %v708_v59 }
 0x21b   : > { %711 = vst.msk [vmem:[%s1216_s22 + $0x8] sm:$0xff] %vm654_vm1, %v709_v60 }
 0x21c PF: > { %s17_s26 = sadd.s32 1, %s1017_s26   ;;  %s1249_s24 = smov %s1013_s25 }
 0x21d   : > { %p14_p5 = scmp.ge.s32.totalorder %s17_s26, 4   ;;  %s1250_s25 = smov %s1252_s27 }
 0x21f   :  { %16 = sbr.rel (!%p14_p5) target bundleno = 2 (0x2), region = 83 }

</bundles_post_ra>
